<compile_context>
chip_gen: v7x
topology: tpu7x:2x2x1
jax: 0.10.0
libtpu: 0.0.40
codegen_flags: <defaults>
</compile_context>

<pallas_src>
import functools

import jax
import jax.numpy as jnp
from jax import lax
from jax.experimental import pallas as pl
from jax.experimental.pallas import tpu as pltpu

BN_EPS = 1e-5
LEAKY_SLOPE = 0.2


def _round_up(x, m):
    return ((x + m - 1) // m) * m


def _noise_encoder_kernel(x_ref, w_ref, gamma_ref, beta_ref, o_ref,
                          sum_ref, ssq_ref, *, kh, kw, wp, ow, q, m_total):
    """Grid = (phase, image).

    x_ref     : [1, C_in_p, L_pad]   padded NCHW image, spatial flattened
    w_ref     : [kh*kw, C_out_p, C_in_p]  per-tap weight matrices
    gamma_ref : [C_out_p, 1]
    beta_ref  : [C_out_p, 1]
    o_ref     : [1, C_out_p, Q]      Q = OH * Wp (lane-dense, garbage W-pad cols)
    sum_ref   : [C_out_p, 1]         persistent per-channel sum scratch
    ssq_ref   : [C_out_p, 1]         persistent per-channel sum-of-squares scratch
    """
    phase = pl.program_id(0)
    img = pl.program_id(1)

    @pl.when((phase == 0) & (img == 0))
    def _init():
        sum_ref[...] = jnp.zeros_like(sum_ref)
        ssq_ref[...] = jnp.zeros_like(ssq_ref)

    # Conv as kh*kw shifted matmuls (MXU, f32 accumulation).  y: [C_out_p, Q]
    cout_p = w_ref.shape[1]
    y = jnp.zeros((cout_p, q), jnp.float32)
    for tap in range(kh * kw):
        off = (tap // kw) * wp + (tap % kw)              # flat-spatial shift
        y = y + jnp.dot(w_ref[tap], x_ref[0, :, off:off + q],
                        preferred_element_type=jnp.float32)

    @pl.when(phase == 0)
    def _accumulate_stats():
        # Mask out the columns that fall in the W-padding region so the
        # BatchNorm statistics are exactly over (N, OH, OW).
        col = lax.broadcasted_iota(jnp.int32, (1, q), 1)
        valid = (col % wp) < ow                           # [1, Q]
        yv = jnp.where(valid, y, 0.0)
        sum_ref[...] += jnp.sum(yv, axis=1, keepdims=True)
        ssq_ref[...] += jnp.sum(yv * yv, axis=1, keepdims=True)

    @pl.when(phase == 1)
    def _normalize_and_store():
        inv_m = 1.0 / m_total
        mean = sum_ref[...] * inv_m                       # [C_out_p, 1]
        var = jnp.maximum(ssq_ref[...] * inv_m - mean * mean, 0.0)  # biased var
        # Fold BN into a single per-channel FMA (rsqrt goes to the EUP slot).
        scale = gamma_ref[...] * lax.rsqrt(var + BN_EPS)
        shift = beta_ref[...] - mean * scale
        yb = y * scale + shift
        o_ref[0] = jnp.where(yb >= 0, yb, LEAKY_SLOPE * yb).astype(o_ref.dtype)


@functools.partial(jax.jit, static_argnames=("stride", "padding"))
def noise_encoder_forward(x_nchw, weight, gamma, beta, *, stride: int, padding: int):
    """x_nchw: [N, Cin, H, W]; weight: [Cout, Cin, kh, kw]; gamma/beta: [Cout]."""
    n, c_in, h, w = x_nchw.shape
    c_out, _, kh, kw = weight.shape
    if stride != 1:
        # TODO(synk): general stride needs a strided lane gather or per-row tiling;
        # the shifted-matmul trick below assumes stride == 1.
        raise NotImplementedError("Pallas NoiseEncoder kernel supports stride=1 only")

    oh = (h + 2 * padding - kh) // stride + 1
    ow = (w + 2 * padding - kw) // stride + 1
    hp, wp = h + 2 * padding, w + 2 * padding
    q = oh * wp                                   # flattened output columns per image
    l_pad = q + (kh - 1) * wp + (kw - 1)          # == hp*wp + kw - 1 (tap-shift slack)

    cin_p = _round_up(c_in, 8)                    # sublane-align the contraction dim
    cout_p = _round_up(c_out, 8)                  # sublane-align the output channels

    # --- wrapper glue: zero pad + reshape only (no transposes, no im2col) ---
    xpad = jnp.pad(x_nchw, ((0, 0), (0, cin_p - c_in),
                            (padding, padding), (padding, padding)))
    xflat = xpad.reshape(n, cin_p, hp * wp)
    xflat = jnp.pad(xflat, ((0, 0), (0, 0), (0, l_pad - hp * wp)))   # [N, Cin_p, L_pad]

    w2 = jnp.transpose(weight, (2, 3, 0, 1)).reshape(kh * kw, c_out, c_in)
    w2 = jnp.pad(w2, ((0, 0), (0, cout_p - c_out), (0, cin_p - c_in)))
    g2 = jnp.pad(gamma, (0, cout_p - c_out)).reshape(cout_p, 1)
    b2 = jnp.pad(beta, (0, cout_p - c_out)).reshape(cout_p, 1)

    m_total = float(n * oh * ow)
    itemsize = 4
    cost = pl.CostEstimate(
        flops=2 * 2 * n * q * cin_p * kh * kw * cout_p,          # conv done in both phases
        transcendentals=n * cout_p,                              # rsqrt in phase 1
        bytes_accessed=(2 * xflat.size + w2.size + g2.size + b2.size
                        + n * cout_p * q) * itemsize,
    )

    kernel = functools.partial(_noise_encoder_kernel,
                               kh=kh, kw=kw, wp=wp, ow=ow, q=q, m_total=m_total)

    out_full = pl.pallas_call(
        kernel,
        out_shape=jax.ShapeDtypeStruct((n, cout_p, q), jnp.float32),
        grid_spec=pltpu.PrefetchScalarGridSpec(
            num_scalar_prefetch=0,
            grid=(2, n),                                          # (phase, image)
            in_specs=[
                pl.BlockSpec((1, cin_p, l_pad), lambda p, i: (i, 0, 0)),
                pl.BlockSpec((kh * kw, cout_p, cin_p), lambda p, i: (0, 0, 0)),
                pl.BlockSpec((cout_p, 1), lambda p, i: (0, 0)),
                pl.BlockSpec((cout_p, 1), lambda p, i: (0, 0)),
            ],
            # During phase 0 stay parked on block 0 (never written there), so each
            # output block is DMA'd to HBM exactly once, after its phase-1 write.
            out_specs=pl.BlockSpec((1, cout_p, q), lambda p, i: (i * p, 0, 0)),
            scratch_shapes=[pltpu.VMEM((cout_p, 1), jnp.float32),
                            pltpu.VMEM((cout_p, 1), jnp.float32)],
        ),
        compiler_params=pltpu.CompilerParams(
            # BN statistics are global over (N, OH, OW) -> sequential grid.
            dimension_semantics=("arbitrary", "arbitrary"),
            vmem_limit_bytes=32 * 1024 * 1024,
        ),
        cost_estimate=cost,
    )(xflat, w2, g2, b2)

    # --- wrapper glue: drop padded channels / padded W columns (already NCHW) ---
    out = out_full[:, :c_out, :].reshape(n, c_out, oh, wp)[:, :, :, :ow]
    return out


def _reference_forward(x_nchw, weight, gamma, beta, *, stride: int, padding: int):
    """Pure-JAX reference for numerical checking."""
    y = lax.conv_general_dilated(
        x_nchw, weight,
        window_strides=(stride, stride),
        padding=[(padding, padding), (padding, padding)],
        dimension_numbers=("NCHW", "OIHW", "NCHW"),
    )
    mean = jnp.mean(y, axis=(0, 2, 3), keepdims=True)
    var = jnp.mean((y - mean) ** 2, axis=(0, 2, 3), keepdims=True)   # biased (train mode)
    y = (y - mean) * lax.rsqrt(var + BN_EPS)
    y = y * gamma.reshape(1, -1, 1, 1) + beta.reshape(1, -1, 1, 1)
    return jnp.where(y >= 0, y, LEAKY_SLOPE * y)


if __name__ == "__main__":
    # Module config: NoiseEncoder(channel_in=4, channel_out=8, kernel_size=3, stride=1, padding=1)
    N, C_IN, H, W = 2, 4, 16, 16
    C_OUT, KSIZE, STRIDE, PAD = 8, 3, 1, 1

    key = jax.random.PRNGKey(0)
    kx, kw_, kg, kb = jax.random.split(key, 4)

    x = jax.random.normal(kx, (N, C_IN, H, W), dtype=jnp.float32)
    fan_in = C_IN * KSIZE * KSIZE
    bound = 1.0 / (fan_in ** 0.5)
    conv_w = jax.random.uniform(kw_, (C_OUT, C_IN, KSIZE, KSIZE),
                                dtype=jnp.float32, minval=-bound, maxval=bound)
    # Non-trivial BN affine params to exercise the folded scale/shift path.
    gamma = 1.0 + 0.1 * jax.random.normal(kg, (C_OUT,), dtype=jnp.float32)
    beta = 0.1 * jax.random.normal(kb, (C_OUT,), dtype=jnp.float32)

    out = noise_encoder_forward(x, conv_w, gamma, beta, stride=STRIDE, padding=PAD)
    out = jax.block_until_ready(out)

    ref = _reference_forward(x, conv_w, gamma, beta, stride=STRIDE, padding=PAD)
    assert out.shape == (N, C_OUT, H, W), out.shape
    assert jnp.allclose(out, ref, atol=1e-4, rtol=1e-4), float(jnp.max(jnp.abs(out - ref)))

    # TODO(synk): forward_clean / forward_noise / cal_class_per_std (per-class std
    # buffer + noise injection) are not part of forward(); not implemented here.
    print("KERNEL_OK")
</pallas_src>

<mosaic_0001>
module attributes {stable_mosaic.version = 11 : i64} {
  func.func @_noise_encoder_kernel(%arg0: i32, %arg1: i32, %arg2: memref<1x8x326xf32, #tpu.memory_space<vmem>>, %arg3: memref<9x8x8xf32, #tpu.memory_space<vmem>>, %arg4: memref<8x1xf32, #tpu.memory_space<vmem>>, %arg5: memref<8x1xf32, #tpu.memory_space<vmem>>, %arg6: memref<1x8x288xf32, #tpu.memory_space<vmem>>, %arg7: memref<8x1xf32, #tpu.memory_space<vmem>>, %arg8: memref<8x1xf32, #tpu.memory_space<vmem>>) attributes {dimension_semantics = [#tpu.dimension_semantics<arbitrary>, #tpu.dimension_semantics<arbitrary>], iteration_bounds = array<i64: 2, 2>, scalar_prefetch = 0 : i64, scratch_operands = 2 : i64, tpu.core_type = #tpu.core_type<tc>, window_params = [{transform_indices = @transform_0, window_bounds = array<i64: 1, 8, 326>}, {pipeline_mode = #tpu.pipeline_mode<synchronous>, transform_indices = @transform_1, window_bounds = array<i64: 9, 8, 8>}, {pipeline_mode = #tpu.pipeline_mode<synchronous>, transform_indices = @transform_2, window_bounds = array<i64: 8, 1>}, {pipeline_mode = #tpu.pipeline_mode<synchronous>, transform_indices = @transform_3, window_bounds = array<i64: 8, 1>}, {transform_indices = @transform_4, window_bounds = array<i64: 1, 8, 288>}]} {
    %c0_i32 = arith.constant 0 : i32
    %0 = arith.cmpi eq, %arg0, %c0_i32 : i32
    %c0_i32_0 = arith.constant 0 : i32
    %1 = arith.cmpi eq, %arg1, %c0_i32_0 : i32
    %2 = arith.andi %0, %1 : i1
    %3 = arith.extui %2 : i1 to i32
    %c0_i32_1 = arith.constant 0 : i32
    %4 = arith.cmpi ne, %3, %c0_i32_1 : i32
    scf.if %4 {
      %cst_53 = arith.constant 0.000000e+00 : f32
      %66 = vector.broadcast %cst_53 : f32 to vector<8x1xf32>
      %c0_54 = arith.constant 0 : index
      %c0_55 = arith.constant 0 : index
      %67 = vector.load %arg7[%c0_54, %c0_55] : memref<8x1xf32, #tpu.memory_space<vmem>>, vector<8x1xf32>
      tpu.vector_store %arg7[%c0_54, %c0_55], %66 {strides = array<i32>} : memref<8x1xf32, #tpu.memory_space<vmem>>, vector<8x1xf32>,
      %cst_56 = arith.constant 0.000000e+00 : f32
      %68 = vector.broadcast %cst_56 : f32 to vector<8x1xf32>
      %c0_57 = arith.constant 0 : index
      %c0_58 = arith.constant 0 : index
      %69 = vector.load %arg8[%c0_57, %c0_58] : memref<8x1xf32, #tpu.memory_space<vmem>>, vector<8x1xf32>
      tpu.vector_store %arg8[%c0_57, %c0_58], %68 {strides = array<i32>} : memref<8x1xf32, #tpu.memory_space<vmem>>, vector<8x1xf32>,
    } else {
    }
    %cst = arith.constant 0.000000e+00 : f32
    %5 = vector.broadcast %cst : f32 to vector<8x288xf32>
    %c0 = arith.constant 0 : index
    %c0_2 = arith.constant 0 : index
    %c0_3 = arith.constant 0 : index
    %6 = vector.load %arg3[%c0, %c0_2, %c0_3] : memref<9x8x8xf32, #tpu.memory_space<vmem>>, vector<1x8x8xf32>
    %7 = vector.shape_cast %6 : vector<1x8x8xf32> to vector<8x8xf32>
    %c0_4 = arith.constant 0 : index
    %c0_5 = arith.constant 0 : index
    %c0_6 = arith.constant 0 : index
    %8 = vector.load %arg2[%c0_4, %c0_5, %c0_6] : memref<1x8x326xf32, #tpu.memory_space<vmem>>, vector<1x8x288xf32>
    %9 = vector.shape_cast %8 : vector<1x8x288xf32> to vector<8x288xf32>
    %cst_7 = arith.constant dense<0.000000e+00> : vector<8x288xf32>
    %10 = tpu.matmul %7, %9, %cst_7 {dimension_numbers = #tpu.dot_dimension_numbers<[1], [0], [0], [1], [0, 0, 1, 1], [], []>} : vector<8x8xf32>, vector<8x288xf32>, vector<8x288xf32> -> vector<8x288xf32>
    %11 = arith.addf %5, %10 : vector<8x288xf32>
    %c1 = arith.constant 1 : index
    %c0_8 = arith.constant 0 : index
    %c0_9 = arith.constant 0 : index
    %12 = vector.load %arg3[%c1, %c0_8, %c0_9] : memref<9x8x8xf32, #tpu.memory_space<vmem>>, vector<1x8x8xf32>
    %13 = vector.shape_cast %12 : vector<1x8x8xf32> to vector<8x8xf32>
    %c0_10 = arith.constant 0 : index
    %c0_11 = arith.constant 0 : index
    %c1_12 = arith.constant 1 : index
    %14 = vector.load %arg2[%c0_10, %c0_11, %c1_12] : memref<1x8x326xf32, #tpu.memory_space<vmem>>, vector<1x8x288xf32>
    %15 = vector.shape_cast %14 : vector<1x8x288xf32> to vector<8x288xf32>
    %cst_13 = arith.constant dense<0.000000e+00> : vector<8x288xf32>
    %16 = tpu.matmul %13, %15, %cst_13 {dimension_numbers = #tpu.dot_dimension_numbers<[1], [0], [0], [1], [0, 0, 1, 1], [], []>} : vector<8x8xf32>, vector<8x288xf32>, vector<8x288xf32> -> vector<8x288xf32>
    %17 = arith.addf %11, %16 : vector<8x288xf32>
    %c2 = arith.constant 2 : index
    %c0_14 = arith.constant 0 : index
    %c0_15 = arith.constant 0 : index
    %18 = vector.load %arg3[%c2, %c0_14, %c0_15] : memref<9x8x8xf32, #tpu.memory_space<vmem>>, vector<1x8x8xf32>
    %19 = vector.shape_cast %18 : vector<1x8x8xf32> to vector<8x8xf32>
    %c0_16 = arith.constant 0 : index
    %c0_17 = arith.constant 0 : index
    %c2_18 = arith.constant 2 : index
    %20 = vector.load %arg2[%c0_16, %c0_17, %c2_18] : memref<1x8x326xf32, #tpu.memory_space<vmem>>, vector<1x8x288xf32>
    %21 = vector.shape_cast %20 : vector<1x8x288xf32> to vector<8x288xf32>
    %cst_19 = arith.constant dense<0.000000e+00> : vector<8x288xf32>
    %22 = tpu.matmul %19, %21, %cst_19 {dimension_numbers = #tpu.dot_dimension_numbers<[1], [0], [0], [1], [0, 0, 1, 1], [], []>} : vector<8x8xf32>, vector<8x288xf32>, vector<8x288xf32> -> vector<8x288xf32>
    %23 = arith.addf %17, %22 : vector<8x288xf32>
    %c3 = arith.constant 3 : index
    %c0_20 = arith.constant 0 : index
    %c0_21 = arith.constant 0 : index
    %24 = vector.load %arg3[%c3, %c0_20, %c0_21] : memref<9x8x8xf32, #tpu.memory_space<vmem>>, vector<1x8x8xf32>
    %25 = vector.shape_cast %24 : vector<1x8x8xf32> to vector<8x8xf32>
    %c0_22 = arith.constant 0 : index
    %c0_23 = arith.constant 0 : index
    %c18 = arith.constant 18 : index
    %26 = vector.load %arg2[%c0_22, %c0_23, %c18] : memref<1x8x326xf32, #tpu.memory_space<vmem>>, vector<1x8x288xf32>
    %27 = vector.shape_cast %26 : vector<1x8x288xf32> to vector<8x288xf32>
    %cst_24 = arith.constant dense<0.000000e+00> : vector<8x288xf32>
    %28 = tpu.matmul %25, %27, %cst_24 {dimension_numbers = #tpu.dot_dimension_numbers<[1], [0], [0], [1], [0, 0, 1, 1], [], []>} : vector<8x8xf32>, vector<8x288xf32>, vector<8x288xf32> -> vector<8x288xf32>
    %29 = arith.addf %23, %28 : vector<8x288xf32>
    %c4 = arith.constant 4 : index
    %c0_25 = arith.constant 0 : index
    %c0_26 = arith.constant 0 : index
    %30 = vector.load %arg3[%c4, %c0_25, %c0_26] : memref<9x8x8xf32, #tpu.memory_space<vmem>>, vector<1x8x8xf32>
    %31 = vector.shape_cast %30 : vector<1x8x8xf32> to vector<8x8xf32>
    %c0_27 = arith.constant 0 : index
    %c0_28 = arith.constant 0 : index
    %c19 = arith.constant 19 : index
    %32 = vector.load %arg2[%c0_27, %c0_28, %c19] : memref<1x8x326xf32, #tpu.memory_space<vmem>>, vector<1x8x288xf32>
    %33 = vector.shape_cast %32 : vector<1x8x288xf32> to vector<8x288xf32>
    %cst_29 = arith.constant dense<0.000000e+00> : vector<8x288xf32>
    %34 = tpu.matmul %31, %33, %cst_29 {dimension_numbers = #tpu.dot_dimension_numbers<[1], [0], [0], [1], [0, 0, 1, 1], [], []>} : vector<8x8xf32>, vector<8x288xf32>, vector<8x288xf32> -> vector<8x288xf32>
    %35 = arith.addf %29, %34 : vector<8x288xf32>
    %c5 = arith.constant 5 : index
    %c0_30 = arith.constant 0 : index
    %c0_31 = arith.constant 0 : index
    %36 = vector.load %arg3[%c5, %c0_30, %c0_31] : memref<9x8x8xf32, #tpu.memory_space<vmem>>, vector<1x8x8xf32>
    %37 = vector.shape_cast %36 : vector<1x8x8xf32> to vector<8x8xf32>
    %c0_32 = arith.constant 0 : index
    %c0_33 = arith.constant 0 : index
    %c20 = arith.constant 20 : index
    %38 = vector.load %arg2[%c0_32, %c0_33, %c20] : memref<1x8x326xf32, #tpu.memory_space<vmem>>, vector<1x8x288xf32>
    %39 = vector.shape_cast %38 : vector<1x8x288xf32> to vector<8x288xf32>
    %cst_34 = arith.constant dense<0.000000e+00> : vector<8x288xf32>
    %40 = tpu.matmul %37, %39, %cst_34 {dimension_numbers = #tpu.dot_dimension_numbers<[1], [0], [0], [1], [0, 0, 1, 1], [], []>} : vector<8x8xf32>, vector<8x288xf32>, vector<8x288xf32> -> vector<8x288xf32>
    %41 = arith.addf %35, %40 : vector<8x288xf32>
    %c6 = arith.constant 6 : index
    %c0_35 = arith.constant 0 : index
    %c0_36 = arith.constant 0 : index
    %42 = vector.load %arg3[%c6, %c0_35, %c0_36] : memref<9x8x8xf32, #tpu.memory_space<vmem>>, vector<1x8x8xf32>
    %43 = vector.shape_cast %42 : vector<1x8x8xf32> to vector<8x8xf32>
    %c0_37 = arith.constant 0 : index
    %c0_38 = arith.constant 0 : index
    %c36 = arith.constant 36 : index
    %44 = vector.load %arg2[%c0_37, %c0_38, %c36] : memref<1x8x326xf32, #tpu.memory_space<vmem>>, vector<1x8x288xf32>
    %45 = vector.shape_cast %44 : vector<1x8x288xf32> to vector<8x288xf32>
    %cst_39 = arith.constant dense<0.000000e+00> : vector<8x288xf32>
    %46 = tpu.matmul %43, %45, %cst_39 {dimension_numbers = #tpu.dot_dimension_numbers<[1], [0], [0], [1], [0, 0, 1, 1], [], []>} : vector<8x8xf32>, vector<8x288xf32>, vector<8x288xf32> -> vector<8x288xf32>
    %47 = arith.addf %41, %46 : vector<8x288xf32>
    %c7 = arith.constant 7 : index
    %c0_40 = arith.constant 0 : index
    %c0_41 = arith.constant 0 : index
    %48 = vector.load %arg3[%c7, %c0_40, %c0_41] : memref<9x8x8xf32, #tpu.memory_space<vmem>>, vector<1x8x8xf32>
    %49 = vector.shape_cast %48 : vector<1x8x8xf32> to vector<8x8xf32>
    %c0_42 = arith.constant 0 : index
    %c0_43 = arith.constant 0 : index
    %c37 = arith.constant 37 : index
    %50 = vector.load %arg2[%c0_42, %c0_43, %c37] : memref<1x8x326xf32, #tpu.memory_space<vmem>>, vector<1x8x288xf32>
    %51 = vector.shape_cast %50 : vector<1x8x288xf32> to vector<8x288xf32>
    %cst_44 = arith.constant dense<0.000000e+00> : vector<8x288xf32>
    %52 = tpu.matmul %49, %51, %cst_44 {dimension_numbers = #tpu.dot_dimension_numbers<[1], [0], [0], [1], [0, 0, 1, 1], [], []>} : vector<8x8xf32>, vector<8x288xf32>, vector<8x288xf32> -> vector<8x288xf32>
    %53 = arith.addf %47, %52 : vector<8x288xf32>
    %c8 = arith.constant 8 : index
    %c0_45 = arith.constant 0 : index
    %c0_46 = arith.constant 0 : index
    %54 = vector.load %arg3[%c8, %c0_45, %c0_46] : memref<9x8x8xf32, #tpu.memory_space<vmem>>, vector<1x8x8xf32>
    %55 = vector.shape_cast %54 : vector<1x8x8xf32> to vector<8x8xf32>
    %c0_47 = arith.constant 0 : index
    %c0_48 = arith.constant 0 : index
    %c38 = arith.constant 38 : index
    %56 = vector.load %arg2[%c0_47, %c0_48, %c38] : memref<1x8x326xf32, #tpu.memory_space<vmem>>, vector<1x8x288xf32>
    %57 = vector.shape_cast %56 : vector<1x8x288xf32> to vector<8x288xf32>
    %cst_49 = arith.constant dense<0.000000e+00> : vector<8x288xf32>
    %58 = tpu.matmul %55, %57, %cst_49 {dimension_numbers = #tpu.dot_dimension_numbers<[1], [0], [0], [1], [0, 0, 1, 1], [], []>} : vector<8x8xf32>, vector<8x288xf32>, vector<8x288xf32> -> vector<8x288xf32>
    %59 = arith.addf %53, %58 : vector<8x288xf32>
    %c0_i32_50 = arith.constant 0 : i32
    %60 = arith.cmpi eq, %arg0, %c0_i32_50 : i32
    %61 = arith.extui %60 : i1 to i32
    %c0_i32_51 = arith.constant 0 : i32
    %62 = arith.cmpi ne, %61, %c0_i32_51 : i32
    scf.if %62 {
      %66 = tpu.iota {dimensions = array<i32: 1>} : vector<1x288xi32>
      %c18_i32 = arith.constant 18 : i32
      %c0_i32_53 = arith.constant 0 : i32
      %67 = arith.cmpi eq, %c18_i32, %c0_i32_53 : i32
      %c1_i32_54 = arith.constant 1 : i32
      %68 = arith.select %67, %c1_i32_54, %c18_i32 : i32
      %69 = vector.broadcast %68 : i32 to vector<1x288xi32>
      %70 = arith.remsi %66, %69 : vector<1x288xi32>
      %c0_i32_55 = arith.constant 0 : i32
      %71 = vector.broadcast %c0_i32_55 : i32 to vector<1x288xi32>
      %72 = arith.cmpi ne, %70, %71 : vector<1x288xi32>
      %c0_i32_56 = arith.constant 0 : i32
      %73 = vector.broadcast %c0_i32_56 : i32 to vector<1x288xi32>
      %74 = arith.cmpi slt, %70, %73 : vector<1x288xi32>
      %c0_i32_57 = arith.constant 0 : i32
      %75 = arith.cmpi slt, %68, %c0_i32_57 : i32
      %76 = vector.broadcast %75 : i1 to vector<1x288xi1>
      %77 = vector.broadcast %76 : vector<1x288xi1> to vector<1x288xi1>
      %78 = arith.xori %74, %77 : vector<1x288xi1>
      %79 = arith.andi %78, %72 : vector<1x288xi1>
      %80 = vector.broadcast %68 : i32 to vector<1x288xi32>
      %81 = arith.addi %70, %80 : vector<1x288xi32>
      %82 = arith.select %79, %81, %70 : vector<1x288xi1>, vector<1x288xi32>
      %c16_i32 = arith.constant 16 : i32
      %83 = vector.broadcast %c16_i32 : i32 to vector<1x288xi32>
      %84 = arith.cmpi slt, %82, %83 : vector<1x288xi32>
      %cst_58 = arith.constant 0.000000e+00 : f32
      %85 = vector.shape_cast %84 : vector<1x288xi1> to vector<1x288xi1>
      %86 = vector.broadcast %85 : vector<1x288xi1> to vector<8x288xi1>
      %87 = vector.broadcast %cst_58 : f32 to vector<8x288xf32>
      %88 = arith.select %86, %59, %87 : vector<8x288xi1>, vector<8x288xf32>
      %c0_59 = arith.constant 0 : index
      %c0_60 = arith.constant 0 : index
      %89 = vector.load %arg7[%c0_59, %c0_60] : memref<8x1xf32, #tpu.memory_space<vmem>>, vector<8x1xf32>
      %cst_61 = arith.constant dense<0.000000e+00> : vector<8xf32>
      %90 = vector.multi_reduction <add>, %88, %cst_61 [1] : vector<8x288xf32> to vector<8xf32>
      %91 = vector.shape_cast %90 : vector<8xf32> to vector<8x1xf32>
      %92 = arith.addf %89, %91 : vector<8x1xf32>
      %c0_62 = arith.constant 0 : index
      %c0_63 = arith.constant 0 : index
      %93 = vector.load %arg7[%c0_62, %c0_63] : memref<8x1xf32, #tpu.memory_space<vmem>>, vector<8x1xf32>
      tpu.vector_store %arg7[%c0_62, %c0_63], %92 {strides = array<i32>} : memref<8x1xf32, #tpu.memory_space<vmem>>, vector<8x1xf32>,
      %c0_64 = arith.constant 0 : index
      %c0_65 = arith.constant 0 : index
      %94 = vector.load %arg8[%c0_64, %c0_65] : memref<8x1xf32, #tpu.memory_space<vmem>>, vector<8x1xf32>
      %95 = arith.mulf %88, %88 : vector<8x288xf32>
      %cst_66 = arith.constant dense<0.000000e+00> : vector<8xf32>
      %96 = vector.multi_reduction <add>, %95, %cst_66 [1] : vector<8x288xf32> to vector<8xf32>
      %97 = vector.shape_cast %96 : vector<8xf32> to vector<8x1xf32>
      %98 = arith.addf %94, %97 : vector<8x1xf32>
      %c0_67 = arith.constant 0 : index
      %c0_68 = arith.constant 0 : index
      %99 = vector.load %arg8[%c0_67, %c0_68] : memref<8x1xf32, #tpu.memory_space<vmem>>, vector<8x1xf32>
      tpu.vector_store %arg8[%c0_67, %c0_68], %98 {strides = array<i32>} : memref<8x1xf32, #tpu.memory_space<vmem>>, vector<8x1xf32>,
    } else {
    }
    %c1_i32 = arith.constant 1 : i32
    %63 = arith.cmpi eq, %arg0, %c1_i32 : i32
    %64 = arith.extui %63 : i1 to i32
    %c0_i32_52 = arith.constant 0 : i32
    %65 = arith.cmpi ne, %64, %c0_i32_52 : i32
    scf.if %65 {
      %c0_53 = arith.constant 0 : index
      %c0_54 = arith.constant 0 : index
      %66 = vector.load %arg7[%c0_53, %c0_54] : memref<8x1xf32, #tpu.memory_space<vmem>>, vector<8x1xf32>
      %cst_55 = arith.constant 0.001953125 : f32
      %67 = vector.broadcast %cst_55 : f32 to vector<8x1xf32>
      %68 = arith.mulf %66, %67 : vector<8x1xf32>
      %c0_56 = arith.constant 0 : index
      %c0_57 = arith.constant 0 : index
      %69 = vector.load %arg8[%c0_56, %c0_57] : memref<8x1xf32, #tpu.memory_space<vmem>>, vector<8x1xf32>
      %cst_58 = arith.constant 0.001953125 : f32
      %70 = vector.broadcast %cst_58 : f32 to vector<8x1xf32>
      %71 = arith.mulf %69, %70 : vector<8x1xf32>
      %72 = arith.mulf %68, %68 : vector<8x1xf32>
      %73 = arith.subf %71, %72 : vector<8x1xf32>
      %cst_59 = arith.constant 0.000000e+00 : f32
      %74 = vector.broadcast %cst_59 : f32 to vector<8x1xf32>
      %75 = arith.maximumf %73, %74 : vector<8x1xf32>
      %c0_60 = arith.constant 0 : index
      %c0_61 = arith.constant 0 : index
      %76 = vector.load %arg4[%c0_60, %c0_61] : memref<8x1xf32, #tpu.memory_space<vmem>>, vector<8x1xf32>
      %cst_62 = arith.constant 9.99999974E-6 : f32
      %77 = vector.broadcast %cst_62 : f32 to vector<8x1xf32>
      %78 = arith.addf %75, %77 : vector<8x1xf32>
      %79 = math.rsqrt %78 : vector<8x1xf32>
      %80 = arith.mulf %76, %79 : vector<8x1xf32>
      %c0_63 = arith.constant 0 : index
      %c0_64 = arith.constant 0 : index
      %81 = vector.load %arg5[%c0_63, %c0_64] : memref<8x1xf32, #tpu.memory_space<vmem>>, vector<8x1xf32>
      %82 = arith.mulf %68, %80 : vector<8x1xf32>
      %83 = arith.subf %81, %82 : vector<8x1xf32>
      %84 = vector.broadcast %80 : vector<8x1xf32> to vector<8x288xf32>
      %85 = arith.mulf %59, %84 : vector<8x288xf32>
      %86 = vector.broadcast %83 : vector<8x1xf32> to vector<8x288xf32>
      %87 = arith.addf %85, %86 : vector<8x288xf32>
      %cst_65 = arith.constant 0.000000e+00 : f32
      %88 = vector.broadcast %cst_65 : f32 to vector<8x288xf32>
      %89 = arith.cmpf oge, %87, %88 : vector<8x288xf32>
      %cst_66 = arith.constant 2.000000e-01 : f32
      %90 = vector.broadcast %cst_66 : f32 to vector<8x288xf32>
      %91 = arith.mulf %90, %87 : vector<8x288xf32>
      %92 = arith.select %89, %87, %91 : vector<8x288xi1>, vector<8x288xf32>
      %c0_67 = arith.constant 0 : index
      %c0_68 = arith.constant 0 : index
      %c0_69 = arith.constant 0 : index
      %93 = vector.load %arg6[%c0_67, %c0_68, %c0_69] : memref<1x8x288xf32, #tpu.memory_space<vmem>>, vector<1x8x288xf32>
      %94 = vector.shape_cast %93 : vector<1x8x288xf32> to vector<8x288xf32>
      %95 = vector.shape_cast %92 : vector<8x288xf32> to vector<1x8x288xf32>
      tpu.vector_store %arg6[%c0_67, %c0_68, %c0_69], %95 {strides = array<i32>} : memref<1x8x288xf32, #tpu.memory_space<vmem>>, vector<1x8x288xf32>,
    } else {
    }
    return
  }
  func.func @transform_0(%arg0: i32, %arg1: i32) -> (i32, i32, i32) {
    %c0_i32 = arith.constant 0 : i32
    %c0_i32_0 = arith.constant 0 : i32
    %c0_i32_1 = arith.constant 0 : i32
    return %arg1, %c0_i32, %c0_i32_0 : i32, i32, i32
  }
  func.func @transform_1(%arg0: i32, %arg1: i32) -> (i32, i32, i32) {
    %c0_i32 = arith.constant 0 : i32
    %c0_i32_0 = arith.constant 0 : i32
    %c0_i32_1 = arith.constant 0 : i32
    %c0_i32_2 = arith.constant 0 : i32
    return %c0_i32, %c0_i32_0, %c0_i32_1 : i32, i32, i32
  }
  func.func @transform_2(%arg0: i32, %arg1: i32) -> (i32, i32) {
    %c0_i32 = arith.constant 0 : i32
    %c0_i32_0 = arith.constant 0 : i32
    %c0_i32_1 = arith.constant 0 : i32
    return %c0_i32, %c0_i32_0 : i32, i32
  }
  func.func @transform_3(%arg0: i32, %arg1: i32) -> (i32, i32) {
    %c0_i32 = arith.constant 0 : i32
    %c0_i32_0 = arith.constant 0 : i32
    %c0_i32_1 = arith.constant 0 : i32
    return %c0_i32, %c0_i32_0 : i32, i32
  }
  func.func @transform_4(%arg0: i32, %arg1: i32) -> (i32, i32, i32) {
    %0 = arith.muli %arg1, %arg0 : i32
    %c0_i32 = arith.constant 0 : i32
    %c0_i32_0 = arith.constant 0 : i32
    %c0_i32_1 = arith.constant 0 : i32
    return %0, %c0_i32, %c0_i32_0 : i32, i32, i32
  }
}

</mosaic_0001>

<bundles_post_ra>
// kernel: noise_encoder_forward.1
= control target key start
LH: loop header
LB: loop body
LE: loop exit
PB: predicated region body
PF: predicated region fallthrough
CT: control target
= control target key end

     0   :  { %s2138_s15 = smov 0   ;;  %s2140_s16 = smov 0   ;;  %s2323_s0 = inlined_call_operand.vmem [shape: f32[2,8,326], index: 0, kind: input, shape index: {}]   ;;  %s2324_s1 = inlined_call_operand.vmem [shape: f32[9,8,8], index: 1, kind: input, shape index: {}]   ;;  %s2325_s2 = inlined_call_operand.vmem [shape: f32[8,1], index: 2, kind: input, shape index: {}]   ;;  %s2326_s3 = inlined_call_operand.vmem [shape: f32[8,1], index: 3, kind: input, shape index: {}]   ;;  %s2327_s4 = inlined_call_operand.vmem [shape: f32[2,8,288], index: 4, kind: output, shape index: {}]  }
   0x1   :  { %s2142_s17 = smov 0   ;;  %s2144_s18 = smov 0  }
   0x2   :  { %s2146_s19 = smov 0  }
   0x3 LB: > { %s23_s20 = sadd.s32 1, %s2091_s17  ;;  %s26_s21 = sadd.s32 1, %s2095_s18  ;;  %s2099_s19 = sphi %s2146_s19, %s14_s19   ;;  %s2095_s18 = sphi %s2144_s18, %s2331_s18   ;;  %s2091_s17 = sphi %s2142_s17, %s2330_s17   ;;  %s2087_s16 = sphi %s2140_s16, %s2329_s16   ;;  %s2083_s15 = sphi %s2138_s15, %s2328_s15  }
   0x4   : > { %p24_p0 = scmp.ge.s32.totalorder %s23_s20, 2  ;;  %p1870_p1 = scmp.ge.s32.totalorder %s2099_s19, 1 }
   0x5   : > { %p176_p2 = scmp.lt.s32.totalorder %s2099_s19, 5 }
   0x6   : > { %s2333_s20 = smov (%p24_p0, %s23_s20), 0  ;;  %s2335_s21 = smov (!%p24_p0, %s26_s21), %s2095_s18 }
   0x7   : > { %p177_p3 = pnand %p1870_p1, %p176_p2  ;;  %p28_p4 = scmp.ge.s32.totalorder %s2335_s21, 2 }
   0x8   : > { %p203_p5 = scmp.lt.s32.totalorder (!%p177_p3), %s2083_s15, 1  ;;  %s208_s22 = smul.u32 (!%p177_p3), %s2083_s15, %s2087_s16 }
   0x9   : > { %s2337_s21 = smov (%p28_p4, %s2335_s21), 0  ;;  %180 = sbr.rel (%p177_p3) target bundleno = 747 (0x2eb), region = 36 }
   0xa   : > { %p215_p6 = scmp.eq.s32.totalorder (!%p177_p3), %s2087_s16, 0  ;;  %p216_p7 = scmp.eq.s32.totalorder (!%p177_p3), %s2083_s15, 0 }
   0xb   : > { %p209_p8 = scmp.lt.s32.totalorder (!%p177_p3), %s208_s22, 1 }
   0xc   : > { %p217_p9 = pnand (!%p177_p3), %p216_p7, %p215_p6 }
  0x10   : > { %s2339_s15 = smov (!%p203_p5, %s2083_s15), 1  ;;  %s2341_s22 = smov (!%p209_p8, %s208_s22), 1 }
  0x11   : > { %s1998_s23 = smul.u32 24, %s2339_s15  ;;  %vm221_vm0 = vcmask (!%p217_p9), 7168   ;;  %v2101_v0 = vmov (!%p217_p9), 0.0  }
  0x12   : > { %s1999_s27 = smul.u32 24, %s2341_s22  ;;  %222 = vst.msk [vmem:[#allocation2] sm:$0xff] (!%p217_p9), %vm221_vm0, %v2101_v0  ;;  %223 = vst.msk [vmem:[#allocation3] sm:$0xff] (!%p217_p9), %vm221_vm0, %v2101_v0 }
  0x13   : > { %s207_s26 = scalar_lea.vmem %s2323_s0, %s1998_s23  ;;  %220 = sbr.rel (%p217_p9) target bundleno = 26 (0x1a), region = 40 }
  0x14   : > { %s2178_s30 = scalar_lea.vmem %s2327_s4, %s1999_s27 }
  0x1a PF: > { %v226_v1 = vld [vmem:[%s207_s26 + $0x8] sm:$0xff]  ;;  %v225_v2 = vld [vmem:[%s207_s26] sm:$0xff]  ;;  %s2102_s5 = smov 127   ;;  %v227_v3 = vld [vmem:[%s207_s26 + $0x10] sm:$0xff]  ;;  %v2103_v4 = vmov 0.0   ;;  %vm2104_vm1 = vmmov 0  }
  0x1b   : > { %235 = vrot.lane.b32.xlu0 %v226_v1, %s2102_s5  ;;  %233 = vrot.lane.b32.xlu1 %v225_v2, %s2102_s5  ;;  %s2105_s6 = smov 126   ;;  %s2106_s7 = smov 110   ;;  %vm239_vm2 = vcmask 1039360   ;;  %v1873_v7 = vld [vmem:[%s2324_s1 + $0x8] sm:$0xff]  ;;  %vm245_vm3 = vcmask 64512   ;;  %vm542_vm4 = vcmask 1031168  }
  0x1c   : > { %1921 = vmatprep.subr.mxu1 %v2103_v4  ;;  %1923 = vmatprep.mubr.msk.f32.mxu1 %vm2104_vm1, %v2103_v4  ;;  %s2107_s8 = smov 109   ;;  %s2108_s9 = smov 108   ;;  %v224_v15 = vld [vmem:[%s2324_s1] sm:$0xff]  ;;  %vm703_vm5 = vcmask 900096   ;;  %v1878_v22 = vld [vmem:[%s2324_s1 + $0x10] sm:$0xff]  ;;  %vm864_vm6 = vcmask 891904  }
  0x1d   : > { %313 = vmatprep.mubr.f32.mxu0 %v2103_v4  ;;  %s2109_s10 = smov 92   ;;  %s2110_s11 = smov 91   ;;  %v1881_v28 = vld [vmem:[%s2324_s1 + $0x18] sm:$0xff]  ;;  %vm1025_vm7 = vcmask 883712   ;;  %v1884_v34 = vld [vmem:[%s2324_s1 + $0x20] sm:$0xff]  ;;  %vm1186_vm8 = vcmask 752640  }
  0x1e   : > { %s2111_s12 = smov 90   ;;  %v1887_v40 = vld [vmem:[%s2324_s1 + $0x28] sm:$0xff]  ;;  %vm1347_vm9 = vcmask 744448   ;;  %v1890_v45 = vld [vmem:[%s2324_s1 + $0x30] sm:$0xff]  ;;  %vm1508_vm10 = vcmask 736256   ;;  %v1893_v51 = vld [vmem:[%s2324_s1 + $0x38] sm:$0xff] }
  0x1f   : > { %237 = vrot.lane.b32.xlu0 %v227_v3, %s2102_s5  ;;  %538 = vrot.lane.b32.xlu1 %v226_v1, %s2105_s6  ;;  %v1896_v53 = vld [vmem:[%s2324_s1 + $0x40] sm:$0xff]  ;;  %p1899_p10 = scmp.ne.s32.totalorder %s2087_s16, 0 }
  0x20   : > { %v1664_v58 = vlaneseq (!%p1899_p10) }
  0x22   : > { %v1665_v59 = vand.u32 (!%p1899_p10), 127, %v1664_v58 }
  0x23   : > { %540 = vrot.lane.b32.xlu0 %v227_v3, %s2105_s6  ;;  %536 = vrot.lane.b32.xlu1 %v225_v2, %s2105_s6 }
  0x24   : > { %v1666_v60 = vadd.s32 (!%p1899_p10), 128, %v1665_v59  ;;  %v1667_v61 = vadd.s32 (!%p1899_p10), 256, %v1665_v59  ;;  %v2280_v62 = vmul.u32.u64.low (!%p1899_p10), 3817748708, %v1665_v59  ;;  %v2281_v63 = vmul.u32.u64.high 3817748708, %v1665_v59, %v2280_v62 }
  0x27   : > { %699 = vrot.lane.b32.xlu0 %v226_v1, %s2106_s7  ;;  %701 = vrot.lane.b32.xlu1 %v227_v3, %s2106_s7 }
  0x2b   : > { %697 = vrot.lane.b32.xlu0 %v225_v2, %s2106_s7  ;;  %860 = vrot.lane.b32.xlu1 %v226_v1, %s2107_s8 }
  0x2f   : > { %862 = vrot.lane.b32.xlu0 %v227_v3, %s2107_s8  ;;  %858 = vrot.lane.b32.xlu1 %v225_v2, %s2107_s8 }
  0x33   : > { %1021 = vrot.lane.b32.xlu0 %v226_v1, %s2108_s9  ;;  %1023 = vrot.lane.b32.xlu1 %v227_v3, %s2108_s9 }
  0x37   : > { %1019 = vrot.lane.b32.xlu0 %v225_v2, %s2108_s9  ;;  %1182 = vrot.lane.b32.xlu1 %v226_v1, %s2109_s10 }
  0x3b   : > { %1184 = vrot.lane.b32.xlu0 %v227_v3, %s2109_s10  ;;  %1180 = vrot.lane.b32.xlu1 %v225_v2, %s2109_s10 }
  0x3f   : > { %1343 = vrot.lane.b32.xlu0 %v226_v1, %s2110_s11  ;;  %1345 = vrot.lane.b32.xlu1 %v227_v3, %s2110_s11 }
  0x43   : > { %1341 = vrot.lane.b32.xlu0 %v225_v2, %s2110_s11  ;;  %1504 = vrot.lane.b32.xlu1 %v226_v1, %s2111_s12 }
  0x47   : > { %1506 = vrot.lane.b32.xlu0 %v227_v3, %s2111_s12  ;;  %1502 = vrot.lane.b32.xlu1 %v225_v2, %s2111_s12 }
  0x8d   : > { %v236_v5 = vpop.permute.xlu0 %235  ;;  %v234_v6 = vpop.permute.xlu1 %233 }
  0x8e   : > { %v240_v11 = vsel %vm239_vm2, %v234_v6, %v236_v5 }
  0x91   : > { %v238_v8 = vpop.permute.xlu0 %237  ;;  %v539_v9 = vpop.permute.xlu1 %538 }
  0x92   : > { %1922 = vmatpush3.msra.mxu1 %v238_v8  ;;  %v241_v10 = vsel %vm239_vm2, %v236_v5, %v238_v8 }
  0x93   : > { %249 = vmatprep.subr.mxu0 %v241_v10  ;;  %1924 = vmatmul.mubr.msk.f32.vlgmr.msra.gmra.mrb[0].mxu1 %vm245_vm3, %v1873_v7 }
  0x94   : > { %250 = vmatpush1.msra.mxu0 %v240_v11  ;;  %1926 = vmatprep.subr.mxu1 %v2103_v4 }
  0x95   : > { %1874 = vmatmul.mubr.msk.f32.vlgmr.msra.gmra.mrb[0].mxu0 %vm245_vm3, %v1873_v7  ;;  %393 = vmatprep.subr.mxu0 %v226_v1  ;;  %v541_v12 = vpop.permute.xlu0 %540  ;;  %v537_v13 = vpop.permute.xlu1 %536  ;;  %v2283_v0 = vmul.u32.u64.low (!%p1899_p10), 3817748708, %v1666_v60  ;;  %v2284_v1 = vmul.u32.u64.high 3817748708, %v1666_v60, %v2283_v0 }
  0x96   : > { %394 = vmatpush1.msra.mxu0 %v225_v2  ;;  %1927 = vmatpush3.msra.mxu1 %v227_v3  ;;  %v544_v14 = vsel %vm542_vm4, %v539_v9, %v541_v12  ;;  %v543_v18 = vsel %vm542_vm4, %v537_v13, %v539_v9  ;;  %v2286_v2 = vmul.u32.u64.low (!%p1899_p10), 3817748708, %v1667_v61  ;;  %v2287_v3 = vmul.u32.u64.high 3817748708, %v1667_v61, %v2286_v2 }
  0x97   : > { %1928 = vmatprep.mubr.msk.f32.mxu1 %vm2104_vm1, %v2103_v4  ;;  %551 = vmatprep.subr.mxu0 %v544_v14  ;;  %v1685_v6 = vshrl.u32 (!%p1899_p10), %v2284_v1, 4 }
  0x98   : > { %1931 = vmatprep.subr.mxu1 %v2103_v4  ;;  %457 = vmatprep.mubr.f32.mxu0 %v2103_v4  ;;  %v1696_v7 = vshrl.u32 (!%p1899_p10), %v2287_v3, 4 }
  0x99   : > { %v700_v16 = vpop.permute.xlu0 %699  ;;  %v702_v17 = vpop.permute.xlu1 %701  ;;  %v1686_v9 = vmul.u32 (!%p1899_p10), 18, %v1685_v6 }
  0x9a   : > { %v705_v19 = vsel %vm703_vm5, %v700_v16, %v702_v17  ;;  %v1697_v10 = vmul.u32 (!%p1899_p10), 18, %v1696_v7 }
  0x9b   : > { %1929 = vmatmul.mubr.msk.f32.vlgmr.msra.gmra.mrb[0].mxu1 %vm245_vm3, %v224_v15  ;;  %v1687_v11 = vsub.s32 (!%p1899_p10), %v1666_v60, %v1686_v9 }
  0x9c   : > { %1932 = vmatpush3.msra.mxu1 %v541_v12  ;;  %1933 = vmatprep.mubr.msk.f32.mxu1 %vm2104_vm1, %v2103_v4  ;;  %v1698_v12 = vsub.s32 (!%p1899_p10), %v1667_v61, %v1697_v10 }
  0x9d   : > { %1876 = vmatmul.mubr.msk.f32.vlgmr.msra.gmra.mrb[0].mxu0 %vm245_vm3, %v224_v15  ;;  %v698_v20 = vpop.permute.xlu0 %697  ;;  %1936 = vmatprep.subr.mxu1 %v2103_v4  ;;  %v861_v21 = vpop.permute.xlu1 %860  ;;  %vm1702_vm14 = vcmp.ne.s32.totalorder (!%p1899_p10), %v1687_v11, 0  ;;  %vm1705_vm0 = vcmp.lt.s32.totalorder (!%p1899_p10), %v1687_v11, 0  ;;  %v1711_v14 = vadd.s32 (!%p1899_p10), 18, %v1687_v11 }
  0x9e   : > { %552 = vmatpush1.msra.mxu0 %v543_v18  ;;  %615 = vmatprep.mubr.f32.mxu0 %v2103_v4  ;;  %v704_v24 = vsel %vm703_vm5, %v698_v20, %v700_v16  ;;  %vm1703_vm15 = vcmp.ne.s32.totalorder (!%p1899_p10), %v1698_v12, 0  ;;  %vm1708_vm2 = vmand (!%p1899_p10), %vm1705_vm0, %vm1702_vm14  ;;  %v1712_v15 = vadd.s32 (!%p1899_p10), 18, %v1698_v12  ;;  %vm1730_vm5 = vcmask (!%p1899_p10), 261120  }
  0x9f   : > { %712 = vmatprep.subr.mxu0 %v705_v19 }
  0xa1   : > { %v863_v23 = vpop.permute.xlu0 %862  ;;  %v859_v26 = vpop.permute.xlu1 %858 }
  0xa2   : > { %v866_v25 = vsel %vm864_vm6, %v861_v21, %v863_v23  ;;  %v865_v30 = vsel %vm864_vm6, %v859_v26, %v861_v21 }
  0xa3   : > { %1934 = vmatmul.mubr.msk.f32.vlgmr.msra.gmra.mrb[0].mxu1 %vm245_vm3, %v1878_v22 }
  0xa4   : > { %1937 = vmatpush3.msra.mxu1 %v702_v17  ;;  %1938 = vmatprep.mubr.msk.f32.mxu1 %vm2104_vm1, %v2103_v4  ;;  %v1714_v17 = vsel (!%p1899_p10), %vm1708_vm2, %v1711_v14, %v1687_v11 }
  0xa5   : > { %1879 = vmatmul.mubr.msk.f32.vlgmr.msra.gmra.mrb[0].mxu0 %vm245_vm3, %v1878_v22  ;;  %1941 = vmatprep.subr.mxu1 %v2103_v4  ;;  %v1022_v27 = vpop.permute.xlu0 %1021  ;;  %v1024_v29 = vpop.permute.xlu1 %1023  ;;  %vm1717_vm6 = vcmp.lt.s32.totalorder (!%p1899_p10), %v1714_v17, 16 }
  0xa6   : > { %713 = vmatpush1.msra.mxu0 %v704_v24  ;;  %776 = vmatprep.mubr.f32.mxu0 %v2103_v4  ;;  %v1027_v31 = vsel %vm1025_vm7, %v1022_v27, %v1024_v29 }
  0xa7   : > { %873 = vmatprep.subr.mxu0 %v866_v25 }
  0xa9   : > { %v1020_v32 = vpop.permute.xlu0 %1019  ;;  %v1183_v33 = vpop.permute.xlu1 %1182 }
  0xaa   : > { %v1026_v36 = vsel %vm1025_vm7, %v1020_v32, %v1022_v27 }
  0xab   : > { %1939 = vmatmul.mubr.msk.f32.vlgmr.msra.gmra.mrb[0].mxu1 %vm245_vm3, %v1881_v28 }
  0xac   : > { %1942 = vmatpush3.msra.mxu1 %v863_v23  ;;  %1943 = vmatprep.mubr.msk.f32.mxu1 %vm2104_vm1, %v2103_v4 }
  0xad   : > { %1882 = vmatmul.mubr.msk.f32.vlgmr.msra.gmra.mrb[0].mxu0 %vm245_vm3, %v1881_v28  ;;  %1946 = vmatprep.subr.mxu1 %v2103_v4  ;;  %v1185_v35 = vpop.permute.xlu0 %1184  ;;  %v1181_v38 = vpop.permute.xlu1 %1180 }
  0xae   : > { %874 = vmatpush1.msra.mxu0 %v865_v30  ;;  %937 = vmatprep.mubr.f32.mxu0 %v2103_v4  ;;  %v1188_v37 = vsel %vm1186_vm8, %v1183_v33, %v1185_v35  ;;  %v1187_v42 = vsel %vm1186_vm8, %v1181_v38, %v1183_v33  ;;  %vm1736_vm8 = vcmask (!%p1899_p10), 7168  }
  0xaf   : > { %1034 = vmatprep.subr.mxu0 %v1027_v31  ;;  %v1728_v31 = vld [vmem:[#allocation2] sm:$0xff] (!%p1899_p10) }
  0xb1   : > { %v1344_v39 = vpop.permute.xlu0 %1343  ;;  %v1346_v41 = vpop.permute.xlu1 %1345 }
  0xb2   : > { %v1349_v43 = vsel %vm1347_vm9, %v1344_v39, %v1346_v41 }
  0xb3   : > { %1944 = vmatmul.mubr.msk.f32.vlgmr.msra.gmra.mrb[0].mxu1 %vm245_vm3, %v1884_v34 }
  0xb4   : > { %1947 = vmatpush3.msra.mxu1 %v1024_v29  ;;  %1948 = vmatprep.mubr.msk.f32.mxu1 %vm2104_vm1, %v2103_v4 }
  0xb5   : > { %1885 = vmatmul.mubr.msk.f32.vlgmr.msra.gmra.mrb[0].mxu0 %vm245_vm3, %v1884_v34  ;;  %1951 = vmatprep.subr.mxu1 %v2103_v4  ;;  %v1342_v44 = vpop.permute.xlu0 %1341  ;;  %v1505_v47 = vpop.permute.xlu1 %1504  ;;  %v1738_v34 = vld [vmem:[#allocation3] sm:$0xff] (!%p1899_p10) }
  0xb6   : > { %1035 = vmatpush1.msra.mxu0 %v1026_v36  ;;  %1098 = vmatprep.mubr.f32.mxu0 %v2103_v4  ;;  %v1348_v48 = vsel %vm1347_vm9, %v1342_v44, %v1344_v39 }
  0xb7   : > { %1195 = vmatprep.subr.mxu0 %v1188_v37 }
  0xb9   : > { %v1507_v46 = vpop.permute.xlu0 %1506  ;;  %v1503_v50 = vpop.permute.xlu1 %1502 }
  0xba   : > { %v1510_v49 = vsel %vm1508_vm10, %v1505_v47, %v1507_v46  ;;  %v1509_v52 = vsel %vm1508_vm10, %v1503_v50, %v1505_v47 }
  0xbb   : > { %1949 = vmatmul.mubr.msk.f32.vlgmr.msra.gmra.mrb[0].mxu1 %vm245_vm3, %v1887_v40 }
  0xbc   : > { %1952 = vmatpush3.msra.mxu1 %v1185_v35  ;;  %1953 = vmatprep.mubr.msk.f32.mxu1 %vm2104_vm1, %v2103_v4 }
  0xbd   : > { %1888 = vmatmul.mubr.msk.f32.vlgmr.msra.gmra.mrb[0].mxu0 %vm245_vm3, %v1887_v40  ;;  %1956 = vmatprep.subr.mxu1 %v2103_v4 }
  0xbe   : > { %1196 = vmatpush1.msra.mxu0 %v1187_v42  ;;  %1259 = vmatprep.mubr.f32.mxu0 %v2103_v4 }
  0xbf   : > { %1356 = vmatprep.subr.mxu0 %v1349_v43 }
  0xc3   : > { %1954 = vmatmul.mubr.msk.f32.vlgmr.msra.gmra.mrb[0].mxu1 %vm245_vm3, %v1890_v45 }
  0xc4   : > { %1957 = vmatpush3.msra.mxu1 %v1346_v41  ;;  %1958 = vmatprep.mubr.msk.f32.mxu1 %vm2104_vm1, %v2103_v4 }
  0xc5   : > { %1891 = vmatmul.mubr.msk.f32.vlgmr.msra.gmra.mrb[0].mxu0 %vm245_vm3, %v1890_v45  ;;  %1961 = vmatprep.subr.mxu1 %v2103_v4 }
  0xc6   : > { %1357 = vmatpush1.msra.mxu0 %v1348_v48  ;;  %1420 = vmatprep.mubr.f32.mxu0 %v2103_v4 }
  0xc7   : > { %1517 = vmatprep.subr.mxu0 %v1510_v49 }
  0xcb   : > { %1959 = vmatmul.mubr.msk.f32.vlgmr.msra.gmra.mrb[0].mxu1 %vm245_vm3, %v1893_v51 }
  0xcc   : > { %1962 = vmatpush3.msra.mxu1 %v1507_v46  ;;  %1963 = vmatprep.mubr.msk.f32.mxu1 %vm2104_vm1, %v2103_v4  ;;  %vm1706_vm1 = vcmp.lt.s32.totalorder (!%p1899_p10), %v1698_v12, 0 }
  0xcd   : > { %1894 = vmatmul.mubr.msk.f32.vlgmr.msra.gmra.mrb[0].mxu0 %vm245_vm3, %v1893_v51 }
  0xce   : > { %1518 = vmatpush1.msra.mxu0 %v1509_v52  ;;  %1581 = vmatprep.mubr.f32.mxu0 %v2103_v4  ;;  %v1674_v4 = vshrl.u32 (!%p1899_p10), %v2281_v63, 4 }
  0xd0   : > { %v1675_v5 = vmul.u32 (!%p1899_p10), 18, %v1674_v4 }
  0xd2   : > { %v1676_v8 = vsub.s32 (!%p1899_p10), %v1665_v59, %v1675_v5 }
  0xd3   : > { %1964 = vmatmul.mubr.msk.f32.vlgmr.msra.gmra.mrb[0].mxu1 %vm245_vm3, %v1896_v53 }
  0xd4   : > { %vm1701_vm11 = vcmp.ne.s32.totalorder (!%p1899_p10), %v1676_v8, 0  ;;  %vm1704_vm12 = vcmp.lt.s32.totalorder (!%p1899_p10), %v1676_v8, 0  ;;  %v1710_v13 = vadd.s32 (!%p1899_p10), 18, %v1676_v8 }
  0xd5   : > { %1897 = vmatmul.mubr.msk.f32.vlgmr.msra.gmra.mrb[0].mxu0 %vm245_vm3, %v1896_v53  ;;  %vm1707_vm13 = vmand (!%p1899_p10), %vm1704_vm12, %vm1701_vm11 }
  0xd6   : > { %v1713_v16 = vsel (!%p1899_p10), %vm1707_vm13, %v1710_v13, %v1676_v8  ;;  %vm1709_vm3 = vmand (!%p1899_p10), %vm1706_vm1, %vm1703_vm15 }
  0xd7   : > { %vm1716_vm4 = vcmp.lt.s32.totalorder (!%p1899_p10), %v1713_v16, 16  ;;  %v1715_v18 = vsel (!%p1899_p10), %vm1709_vm3, %v1712_v15, %v1698_v12 }
  0xd8   : > { %vm1718_vm7 = vcmp.lt.s32.totalorder (!%p1899_p10), %v1715_v18, 16 }
 0x1a3   : > { %1663 = sbr.rel (%p1899_p10) target bundleno = 580 (0x244), region = 44 }
 0x1a6   : > { %v2273_v54 = vpop.f32.mrb[0].mxu1 }
 0x1a7   : > { %v1965_v55 = vpop.f32.mrb[1].mxu1  ;;  %v1727_v22 = vsel (!%p1899_p10), %vm1718_vm7, %v2273_v54, 0.0 }
 0x1a8   : > { %v2275_v56 = vpop.f32.mrb[0].mxu0  ;;  %v1731_v24 = vsel (!%p1899_p10), %vm1730_vm5, %v1727_v22, 0.0  ;;  %v1741_v26 = vmul.f32 (!%p1899_p10), %v1727_v22, %v1727_v22 }
 0x1a9   : > { %v2277_v57 = vpop.f32.mrb[1].mxu0  ;;  %v1725_v19 = vsel (!%p1899_p10), %vm1716_vm4, %v2275_v56, 0.0 }
 0x1aa   : > { %v1739_v20 = vmul.f32 %v1725_v19, %v1725_v19  ;;  %v1726_v21 = vsel %vm1717_vm6, %v2277_v57, 0.0  ;;  %v1743_v29 = vsel %vm1730_vm5, %v1741_v26, 0.0 }
 0x1ab   : > { %v1729_v23 = vadd.f32 %v1726_v21, %v1725_v19  ;;  %v1740_v25 = vmul.f32 %v1726_v21, %v1726_v21 }
 0x1ad   : > { %v1732_v27 = vadd.f32 %v1731_v24, %v1729_v23  ;;  %v1742_v28 = vadd.f32 %v1740_v25, %v1739_v20 }
 0x1af   : > { %1733 = vadd.xlane.f32.xlu0 %v1732_v27  ;;  %v1744_v30 = vadd.f32 %v1743_v29, %v1742_v28 }
 0x1b3   : > { %1745 = vadd.xlane.f32.xlu0 %v1744_v30 }
 0x23c   : > { %v1734_v32 = vpop.xlane.xlu0 %1733 }
 0x23d   : > { %v1735_v33 = vadd.f32 %v1734_v32, %v1728_v31 }
 0x23f   : > { %1737 = vst.msk [vmem:[#allocation2] sm:$0xff] %vm1736_vm8, %v1735_v33 }
 0x240   : > { %v1746_v35 = vpop.xlane.xlu0 %1745 }
 0x241   : > { %v1747_v36 = vadd.f32 %v1746_v35, %v1738_v34 }
 0x243   : > { %1748 = vst.msk [vmem:[#allocation3] sm:$0xff] %vm1736_vm8, %v1747_v36 }
 0x244 PF: > { %p1900_p11 = scmp.ne.s32.totalorder %s2087_s16, 1 }
 0x245   : > { %v2112_v39 = vmov (!%p1900_p11), 0   ;;  %v1760_v46 = vld [vmem:[%s2325_s2] sm:$0xff] (!%p1900_p11)  ;;  %vm1794_vm12 = vcmask (!%p1900_p11), 261120  }
 0x246   : > { %1752 = sbr.rel (%p1900_p11) target bundleno = 747 (0x2eb), region = 48  ;;  %v1753_v37 = vld [vmem:[#allocation2] sm:$0xff] (!%p1900_p11)  ;;  %2058 = vset.pattern.permute.xlu0 (!%p1900_p11), %v2112_v39 }
 0x247   : > { %v1754_v40 = vmul.f32 (!%p1900_p11), 0.001953125, %v1753_v37  ;;  %v1764_v49 = vld [vmem:[%s2326_s3] sm:$0xff] (!%p1900_p11) }
 0x249   : > { %v1757_v42 = vmul.f32 (!%p1900_p11), %v1754_v40, %v1754_v40 }
 0x24a   : > { %v1755_v38 = vld [vmem:[#allocation3] sm:$0xff] (!%p1900_p11) }
 0x24b   : > { %v1756_v41 = vmul.f32 (!%p1900_p11), 0.001953125, %v1755_v38 }
 0x24d   : > { %v1758_v43 = vsub.f32 %v1756_v41, %v1757_v42 }
 0x24f   : > { %v1759_v44 = vmax.f32 %v1758_v43, 0.0 }
 0x251   : > { %v1761_v45 = vadd.f32 1e-05, %v1759_v44 }
 0x253   : > { %2059 = vrsqrt.f32 %v1761_v45 }
 0x25d   : > { %v2060_v47 = vpop.eup %2059 }
 0x25e   : > { %v1763_v48 = vmul.f32 %v2060_v47, %v1760_v46 }
 0x260   : > { %1769 = vperm.xlu0 %2058, %v1763_v48   ;;  %v1765_v50 = vmul.f32 %v1763_v48, %v1754_v40 }
 0x262   : > { %v1766_v51 = vsub.f32 %v1764_v49, %v1765_v50 }
 0x264   : > { %1777 = vperm.xlu0 %2058, %v1766_v51  }
 0x2df   : > { %v1770_v52 = vpop.permute.xlu0 %1769 }
 0x2e0   : > { %v1772_v53 = vmul.f32 %v1770_v52, %v2275_v56  ;;  %v1773_v55 = vmul.f32 %v1770_v52, %v2277_v57  ;;  %v1774_v58 = vmul.f32 %v1770_v52, %v2273_v54 }
 0x2e3   : > { %v1778_v59 = vpop.permute.xlu0 %1777 }
 0x2e4   : > { %v1780_v60 = vadd.f32 %v1778_v59, %v1772_v53  ;;  %v1781_v61 = vadd.f32 %v1778_v59, %v1773_v55  ;;  %v1782_v62 = vadd.f32 %v1778_v59, %v1774_v58 }
 0x2e6   : > { %vm1783_vm9 = vcmp.ge.f32.partialorder %v1780_v60, 0.0  ;;  %vm1784_vm10 = vcmp.ge.f32.partialorder %v1781_v61, 0.0  ;;  %vm1785_vm11 = vcmp.ge.f32.partialorder %v1782_v62, 0.0  ;;  %v1786_v63 = vmul.f32 0.2, %v1780_v60 }
 0x2e7   : > { %v1787_v0 = vmul.f32 0.2, %v1781_v61  ;;  %v1788_v1 = vmul.f32 0.2, %v1782_v62 }
 0x2e8   : > { %v1789_v2 = vsel %vm1783_vm9, %v1780_v60, %v1786_v63 }
 0x2e9   : > { %v1790_v56 = vsel %vm1784_vm10, %v1781_v61, %v1787_v0  ;;  %v1791_v3 = vsel %vm1785_vm11, %v1782_v62, %v1788_v1  ;;  %1792 = vst [vmem:[%s2178_s30] sm:$0xff] %v1789_v2 }
 0x2ea   : > { %1793 = vst [vmem:[%s2178_s30 + $0x8] sm:$0xff] %v1790_v56  ;;  %1795 = vst.msk [vmem:[%s2178_s30 + $0x10] sm:$0xff] %vm1794_vm12, %v1791_v3 }
 0x2eb PF: > { %s14_s19 = sadd.s32 1, %s2099_s19   ;;  %s2328_s15 = smov %s2091_s17 }
 0x2ec   : > { %p11_p12 = scmp.ge.s32.totalorder %s14_s19, 6   ;;  %s2329_s16 = smov %s2095_s18 }
 0x2ed   : > { %s2330_s17 = smov %s2333_s20  ;;  %s2331_s18 = smov %s2337_s21 }
 0x2ee   :  { %13 = sbr.rel (!%p11_p12) target bundleno = 3 (0x3), region = 86 }

</bundles_post_ra>
